<compile_context>
chip_gen: v7x
topology: tpu7x:2x2x1
jax: 0.10.0
libtpu: 0.0.40
codegen_flags: <defaults>
</compile_context>

<pallas_src>
import functools

import jax
import jax.numpy as jnp
from jax.experimental import pallas as pl
from jax.experimental.pallas import tpu as pltpu


def spatial_encoder_kernel(xt_ref, w1_ref, b1_ref, w2_ref, b2_ref, o_ref):
    # xt_ref: (2, tile)   w1_ref: (H, 2)  b1_ref: (H, 1)
    # w2_ref: (D, H)      b2_ref: (D, 1)  o_ref : (D, tile)
    x0 = xt_ref[0:1, :]                      # (1, tile), lane-dense
    x1 = xt_ref[1:2, :]                      # (1, tile)

    # Layer 1 on the VPU (K=2 is far too small for the MXU); all math in f32.
    h = w1_ref[:, 0:1] * x0 + w1_ref[:, 1:2] * x1 + b1_ref[...]   # (H, tile)
    h = jnp.maximum(h, 0.0)                                        # ReLU

    # Layer 2 on the MXU: (D, H) @ (H, tile) -> (D, tile), lane-dense result.
    out = jnp.dot(w2_ref[...], h, preferred_element_type=jnp.float32)
    o_ref[...] = (out + b2_ref[...]).astype(o_ref.dtype)          # fold bias+cast


@functools.partial(jax.jit, static_argnames=("tile_n",))
def spatial_encoder_pallas(state, w1, b1, w2, b2, *, tile_n=4096):
    """state: (..., 2) -> (..., head_dim).  w1:(H,2) b1:(H,) w2:(D,H) b2:(D,)."""
    orig_shape = state.shape
    assert orig_shape[-1] == 2, "SpatialEncoder expects last dim == 2"
    hidden_dim = w1.shape[0]
    head_dim = w2.shape[0]

    x = state.reshape(-1, 2)
    n = x.shape[0]

    # Tile along N (the lane axis): multiple of 128, big enough to amortize
    # per-grid-step overhead, capped so the grid keeps >= 2 parallel steps
    # (keeps both v7x TensorCores busy; harmless on v5e/v6e).
    tile_n = max(128, (tile_n // 128) * 128)
    two_step_cap = 128 * pl.cdiv(pl.cdiv(n, 2), 128)
    tile = min(tile_n, max(128, two_step_cap))

    n_pad = pl.cdiv(n, tile) * tile
    # Transposed lane-dense input; transpose + zero-pad fuse into one pass
    # under jit.  Padded columns produce garbage that is sliced off below.
    xt = jnp.pad(x.T, ((0, 0), (0, n_pad - n)))

    grid = (n_pad // tile,)

    cost = pl.CostEstimate(
        flops=2 * n * hidden_dim * (2 + head_dim),
        transcendentals=0,
        bytes_accessed=4 * n * (2 + head_dim)
        + 4 * (3 * hidden_dim + hidden_dim * head_dim + head_dim),
    )

    out_t = pl.pallas_call(
        spatial_encoder_kernel,
        out_shape=jax.ShapeDtypeStruct((head_dim, n_pad), state.dtype),
        grid_spec=pltpu.PrefetchScalarGridSpec(
            num_scalar_prefetch=0,
            grid=grid,
            in_specs=[
                pl.BlockSpec((2, tile), lambda i: (0, i)),               # xT tile
                pl.BlockSpec((hidden_dim, 2), lambda i: (0, 0)),         # w1 (whole)
                pl.BlockSpec((hidden_dim, 1), lambda i: (0, 0)),         # b1 column
                pl.BlockSpec((head_dim, hidden_dim), lambda i: (0, 0)),  # w2 (whole)
                pl.BlockSpec((head_dim, 1), lambda i: (0, 0)),           # b2 column
            ],
            out_specs=pl.BlockSpec((head_dim, tile), lambda i: (0, i)),
        ),
        compiler_params=pltpu.CompilerParams(
            dimension_semantics=("parallel",)),
        cost_estimate=cost,
    )(xt, w1, b1.reshape(hidden_dim, 1), w2, b2.reshape(head_dim, 1))

    out = out_t[:, :n].T                      # slice + transpose fuse under jit
    return out.reshape(*orig_shape[:-1], head_dim)


def init_params(key, hidden_dim, head_dim, dtype=jnp.float32):
    """PyTorch nn.Linear-style init: weight (out, in), bias (out,),
    uniform(-1/sqrt(fan_in), 1/sqrt(fan_in))."""
    k1, k2, k3, k4 = jax.random.split(key, 4)
    bound1 = 1.0 / jnp.sqrt(2.0)
    bound2 = 1.0 / jnp.sqrt(float(hidden_dim))
    w1 = jax.random.uniform(k1, (hidden_dim, 2), dtype, -bound1, bound1)
    b1 = jax.random.uniform(k2, (hidden_dim,), dtype, -bound1, bound1)
    w2 = jax.random.uniform(k3, (head_dim, hidden_dim), dtype, -bound2, bound2)
    b2 = jax.random.uniform(k4, (head_dim,), dtype, -bound2, bound2)
    return w1, b1, w2, b2


def spatial_encoder_ref(state, w1, b1, w2, b2):
    # Layer 1 written as the same f32 elementwise FMA the kernel uses (exact),
    # layer 2 as a default-precision matmul like the kernel's MXU dot.
    h = state[..., 0:1] * w1[:, 0] + state[..., 1:2] * w1[:, 1] + b1
    h = jnp.maximum(h, 0.0)
    return h @ w2.T + b2


if __name__ == "__main__":
    key = jax.random.PRNGKey(0)
    k_param, k_state = jax.random.split(key)

    hidden_dim = 32
    head_dim = 16

    w1, b1, w2, b2 = init_params(k_param, hidden_dim, head_dim)

    # state: (batch=2, num_samples=100, 2) sampled (x, y) locations
    state = jax.random.normal(k_state, (2, 100, 2), dtype=jnp.float32)

    out = spatial_encoder_pallas(state, w1, b1, w2, b2)
    out = jax.block_until_ready(out)

    ref = spatial_encoder_ref(state, w1, b1, w2, b2)
    assert out.shape == (2, 100, head_dim), out.shape
    max_err = float(jnp.max(jnp.abs(out - ref)))
    assert jnp.allclose(out, ref, atol=5e-5, rtol=5e-5), max_err

    print("KERNEL_OK")
</pallas_src>

<mosaic_0001>
module attributes {stable_mosaic.version = 11 : i64} {
  func.func @spatial_encoder_kernel(%arg0: i32, %arg1: memref<2x128xf32, #tpu.memory_space<vmem>>, %arg2: memref<32x2xf32, #tpu.memory_space<vmem>>, %arg3: memref<32x1xf32, #tpu.memory_space<vmem>>, %arg4: memref<16x32xf32, #tpu.memory_space<vmem>>, %arg5: memref<16x1xf32, #tpu.memory_space<vmem>>, %arg6: memref<16x128xf32, #tpu.memory_space<vmem>>) attributes {dimension_semantics = [#tpu.dimension_semantics<parallel>], iteration_bounds = array<i64: 2>, scalar_prefetch = 0 : i64, scratch_operands = 0 : i64, tpu.core_type = #tpu.core_type<tc>, window_params = [{transform_indices = @transform_0, window_bounds = array<i64: 2, 128>}, {pipeline_mode = #tpu.pipeline_mode<synchronous>, transform_indices = @transform_1, window_bounds = array<i64: 32, 2>}, {pipeline_mode = #tpu.pipeline_mode<synchronous>, transform_indices = @transform_2, window_bounds = array<i64: 32, 1>}, {pipeline_mode = #tpu.pipeline_mode<synchronous>, transform_indices = @transform_3, window_bounds = array<i64: 16, 32>}, {pipeline_mode = #tpu.pipeline_mode<synchronous>, transform_indices = @transform_4, window_bounds = array<i64: 16, 1>}, {transform_indices = @transform_5, window_bounds = array<i64: 16, 128>}]} {
    %c0 = arith.constant 0 : index
    %c0_0 = arith.constant 0 : index
    %0 = vector.load %arg1[%c0, %c0_0] : memref<2x128xf32, #tpu.memory_space<vmem>>, vector<1x128xf32>
    %c1 = arith.constant 1 : index
    %c0_1 = arith.constant 0 : index
    %1 = vector.load %arg1[%c1, %c0_1] : memref<2x128xf32, #tpu.memory_space<vmem>>, vector<1x128xf32>
    %c0_2 = arith.constant 0 : index
    %c0_3 = arith.constant 0 : index
    %2 = vector.load %arg2[%c0_2, %c0_3] : memref<32x2xf32, #tpu.memory_space<vmem>>, vector<32x1xf32>
    %3 = vector.broadcast %2 : vector<32x1xf32> to vector<32x128xf32>
    %4 = vector.broadcast %0 : vector<1x128xf32> to vector<32x128xf32>
    %5 = arith.mulf %3, %4 : vector<32x128xf32>
    %c0_4 = arith.constant 0 : index
    %c1_5 = arith.constant 1 : index
    %6 = vector.load %arg2[%c0_4, %c1_5] : memref<32x2xf32, #tpu.memory_space<vmem>>, vector<32x1xf32>
    %7 = vector.broadcast %6 : vector<32x1xf32> to vector<32x128xf32>
    %8 = vector.broadcast %1 : vector<1x128xf32> to vector<32x128xf32>
    %9 = arith.mulf %7, %8 : vector<32x128xf32>
    %10 = arith.addf %5, %9 : vector<32x128xf32>
    %c0_6 = arith.constant 0 : index
    %c0_7 = arith.constant 0 : index
    %11 = vector.load %arg3[%c0_6, %c0_7] : memref<32x1xf32, #tpu.memory_space<vmem>>, vector<32x1xf32>
    %12 = vector.broadcast %11 : vector<32x1xf32> to vector<32x128xf32>
    %13 = arith.addf %10, %12 : vector<32x128xf32>
    %cst = arith.constant 0.000000e+00 : f32
    %14 = vector.broadcast %cst : f32 to vector<32x128xf32>
    %15 = arith.maximumf %13, %14 : vector<32x128xf32>
    %c0_8 = arith.constant 0 : index
    %c0_9 = arith.constant 0 : index
    %16 = vector.load %arg4[%c0_8, %c0_9] : memref<16x32xf32, #tpu.memory_space<vmem>>, vector<16x32xf32>
    %cst_10 = arith.constant dense<0.000000e+00> : vector<16x128xf32>
    %17 = tpu.matmul %16, %15, %cst_10 {dimension_numbers = #tpu.dot_dimension_numbers<[1], [0], [0], [1], [0, 0, 1, 1], [], []>} : vector<16x32xf32>, vector<32x128xf32>, vector<16x128xf32> -> vector<16x128xf32>
    %c0_11 = arith.constant 0 : index
    %c0_12 = arith.constant 0 : index
    %18 = vector.load %arg5[%c0_11, %c0_12] : memref<16x1xf32, #tpu.memory_space<vmem>>, vector<16x1xf32>
    %19 = vector.broadcast %18 : vector<16x1xf32> to vector<16x128xf32>
    %20 = arith.addf %17, %19 : vector<16x128xf32>
    %c0_13 = arith.constant 0 : index
    %c0_14 = arith.constant 0 : index
    %21 = vector.load %arg6[%c0_13, %c0_14] : memref<16x128xf32, #tpu.memory_space<vmem>>, vector<16x128xf32>
    tpu.vector_store %arg6[%c0_13, %c0_14], %20 {strides = array<i32>} : memref<16x128xf32, #tpu.memory_space<vmem>>, vector<16x128xf32>,
    return
  }
  func.func @transform_0(%arg0: i32) -> (i32, i32) {
    %c0_i32 = arith.constant 0 : i32
    %c0_i32_0 = arith.constant 0 : i32
    return %c0_i32, %arg0 : i32, i32
  }
  func.func @transform_1(%arg0: i32) -> (i32, i32) {
    %c0_i32 = arith.constant 0 : i32
    %c0_i32_0 = arith.constant 0 : i32
    %c0_i32_1 = arith.constant 0 : i32
    return %c0_i32, %c0_i32_0 : i32, i32
  }
  func.func @transform_2(%arg0: i32) -> (i32, i32) {
    %c0_i32 = arith.constant 0 : i32
    %c0_i32_0 = arith.constant 0 : i32
    %c0_i32_1 = arith.constant 0 : i32
    return %c0_i32, %c0_i32_0 : i32, i32
  }
  func.func @transform_3(%arg0: i32) -> (i32, i32) {
    %c0_i32 = arith.constant 0 : i32
    %c0_i32_0 = arith.constant 0 : i32
    %c0_i32_1 = arith.constant 0 : i32
    return %c0_i32, %c0_i32_0 : i32, i32
  }
  func.func @transform_4(%arg0: i32) -> (i32, i32) {
    %c0_i32 = arith.constant 0 : i32
    %c0_i32_0 = arith.constant 0 : i32
    %c0_i32_1 = arith.constant 0 : i32
    return %c0_i32, %c0_i32_0 : i32, i32
  }
  func.func @transform_5(%arg0: i32) -> (i32, i32) {
    %c0_i32 = arith.constant 0 : i32
    %c0_i32_0 = arith.constant 0 : i32
    return %c0_i32, %arg0 : i32, i32
  }
}

</mosaic_0001>

<bundles_post_ra>
// kernel: spatial_encoder_pallas.1
= control target key start
LH: loop header
LB: loop body
LE: loop exit
PB: predicated region body
PF: predicated region fallthrough
CT: control target
= control target key end

     0   :  { %s631_s18 = smov 0   ;;  %s633_s19 = smov 0   ;;  %s720_s0 = inlined_call_operand.vmem [shape: f32[2,256], index: 0, kind: input, shape index: {}]   ;;  %s721_s1 = inlined_call_operand.vmem [shape: f32[32,2], index: 1, kind: input, shape index: {}]   ;;  %s722_s2 = inlined_call_operand.vmem [shape: f32[32,1], index: 2, kind: input, shape index: {}]   ;;  %s723_s3 = inlined_call_operand.vmem [shape: f32[16,32], index: 3, kind: input, shape index: {}]   ;;  %s724_s4 = inlined_call_operand.vmem [shape: f32[16,1], index: 4, kind: input, shape index: {}]   ;;  %s725_s5 = inlined_call_operand.vmem [shape: f32[16,256], index: 5, kind: output, shape index: {}]  }
   0x1   :  { %s635_s20 = smov 0  }
   0x2 LB: > { %s644_s21 = sadd.s32 4294967295, %s597_s20   ;;  %s646_s22 = sadd.s32 1, %s597_s20   ;;  %s597_s20 = sphi %s635_s20, %s729_s20   ;;  %s593_s19 = sphi %s633_s19, %s728_s19   ;;  %s589_s18 = sphi %s631_s18, %s727_s18  }
   0x3   : > { %s129_s23 = ssub.s32 %s597_s20, %s646_s22  ;;  %s132_s24 = sadd.s32 1, %s593_s19 }
   0x4   : > { %p130_p0 = scmp.eq.s32.totalorder %s129_s23, 0  ;;  %p142_p1 = scmp.ne.s32.totalorder %s593_s19, %s589_s18 }
   0x5   : > { %p143_p2 = scmp.eq.s32.totalorder %s644_s21, 1  ;;  %p507_p3 = scmp.ge.s32.totalorder %s597_s20, 1 }
   0x6   : > { %s654_s25 = scalar_select %p130_p0, %s593_s19, %s132_s24  }
   0x7   : > { %p656_p4 = por %p143_p2, %p142_p1  ;;  %p186_p5 = scmp.lt.s32.totalorder %s597_s20, 3 }
   0x9   : > { %p187_p6 = pnand %p507_p3, %p186_p5 }
   0xa   : > { %v220_v0 = vld [vmem:[%s721_s1 + $0x10] sm:$0xff] (!%p187_p6)  ;;  %v218_v1 = vld [vmem:[%s721_s1] sm:$0xff] (!%p187_p6)  ;;  %v599_v2 = vmov (!%p187_p6), 1   ;;  %v219_v3 = vld [vmem:[%s721_s1 + $0x8] sm:$0xff] (!%p187_p6)  ;;  %v600_v4 = vmov (!%p187_p6), 0   ;;  %vm324_vm0 = vcmask (!%p187_p6), 261120  }
   0xb   : > { %190 = sbr.rel (%p187_p6) target bundleno = 401 (0x191), region = 40  ;;  %571 = vset.pattern.permute.xlu0 (!%p187_p6), %v599_v2  ;;  %569 = vset.pattern.permute.xlu1 (!%p187_p6), %v599_v2  ;;  %v221_v5 = vld [vmem:[%s721_s1 + $0x18] sm:$0xff] (!%p187_p6)  ;;  %v279_v6 = vld [vmem:[%s722_s2 + $0x8] sm:$0xff] (!%p187_p6)  ;;  %v278_v7 = vld [vmem:[%s722_s2] sm:$0xff] (!%p187_p6)  ;;  %p212_p7 = scmp.lt.s32.totalorder (!%p187_p6), %s644_s21, 1 }
   0xc   : > { %259 = vperm.xlu0 (!%p187_p6), %571, %v220_v0   ;;  %251 = vperm.xlu1 (!%p187_p6), %569, %v218_v1   ;;  %v312_v8 = vld [vmem:[%s724_s4] sm:$0xff] (!%p187_p6)  ;;  %v280_v9 = vld [vmem:[%s722_s2 + $0x10] sm:$0xff] (!%p187_p6)  ;;  %v281_v10 = vld [vmem:[%s722_s2 + $0x18] sm:$0xff] (!%p187_p6)  ;;  %s209_s12 = sand.u32 (!%p187_p6), 1, %s589_s18  }
   0xd   : > { %v313_v11 = vld [vmem:[%s724_s4 + $0x8] sm:$0xff] (!%p187_p6)  ;;  %v310_v12 = vld [vmem:[%s723_s3] sm:$0xff] (!%p187_p6)  ;;  %s508_s13 = sshll.u32 (!%p187_p6), %s209_s12, 4 }
   0xe   : > { %532 = vmatprep.mubr.msk.f32.mxu0 (!%p187_p6), %vm324_vm0, %v310_v12  ;;  %v311_v49 = vld [vmem:[%s723_s3 + $0x8] sm:$0xff] (!%p187_p6)  ;;  %s211_s14 = scalar_lea.vmem (!%p187_p6), [#allocation2], %s508_s13 }
  0x10   : > { %572 = vset.pattern.permute.xlu0 (!%p187_p6), %v600_v4  ;;  %255 = vperm.xlu1 (!%p187_p6), %569, %v219_v3  }
  0x11   : > { %224 = vperm.xlu0 (!%p187_p6), %572, %v218_v1  }
  0x12   : > { %s213_s30 = scalar_select %p212_p7, %s644_s21, 1 }
  0x13   : > { %s515_s15 = sshll.u32 (%p656_p4), %s644_s21, 3 }
  0x14   : > { %570 = vset.pattern.permute.xlu1 %v600_v4  ;;  %s509_s6 = sshll.u32 %s213_s30, 1  ;;  %s416_s18 = scalar_lea.vmem (%p656_p4), %s725_s5, %s515_s15 }
  0x15   : > { %229 = vperm.xlu0 %572, %v219_v3   ;;  %239 = vperm.xlu1 %570, %v221_v5   ;;  %s215_s9 = scalar_lea.vmem %s720_s0, %s509_s6 }
  0x16   : > { %v510_v19 = vld [vmem:[%s215_s9] ss:$0 sm:$0xff]  ;;  %v511_v21 = vld [vmem:[%s215_s9 + $0x1] ss:$0 sm:$0xff] }
  0x19   : > { %234 = vperm.xlu0 %572, %v220_v0   ;;  %573 = vset.pattern.permute.xlu1 %v599_v2 }
  0x1a   : > { %263 = vperm.xlu1 %573, %v221_v5  }
  0x1d   : > { %289 = vperm.xlu0 %572, %v279_v6  }
  0x1e   : > { %574 = vset.pattern.permute.xlu1 %v600_v4 }
  0x1f   : > { %284 = vperm.xlu1 %574, %v278_v7  }
  0x21   : > { %316 = vperm.xlu0 %572, %v312_v8  }
  0x23   : > { %294 = vperm.xlu1 %574, %v280_v9  }
  0x27   : > { %299 = vperm.xlu1 %574, %v281_v10  }
  0x2b   : > { %321 = vperm.xlu1 %574, %v313_v11  }
  0x8b   : > { %v252_v13 = vpop.permute.xlu1 %251  ;;  %v260_v14 = vpop.permute.xlu0 %259 }
  0x8c   : > { %v270_v26 = vmul.f32 %v511_v21, %v252_v13  ;;  %v272_v34 = vmul.f32 %v511_v21, %v260_v14 }
  0x8f   : > { %v256_v15 = vpop.permute.xlu1 %255 }
  0x90   : > { %v225_v16 = vpop.permute.xlu0 %224  ;;  %v271_v23 = vmul.f32 %v511_v21, %v256_v15 }
  0x91   : > { %v246_v24 = vmul.f32 %v510_v19, %v225_v16 }
  0x93   : > { %v274_v30 = vadd.f32 %v270_v26, %v246_v24 }
  0x94   : > { %v230_v17 = vpop.permute.xlu0 %229  ;;  %v240_v18 = vpop.permute.xlu1 %239 }
  0x95   : > { %v247_v20 = vmul.f32 %v510_v19, %v230_v17  ;;  %v249_v39 = vmul.f32 %v510_v19, %v240_v18 }
  0x97   : > { %v275_v27 = vadd.f32 %v271_v23, %v247_v20 }
  0x98   : > { %v235_v22 = vpop.permute.xlu0 %234 }
  0x99   : > { %v264_v25 = vpop.permute.xlu1 %263  ;;  %v248_v32 = vmul.f32 %v510_v19, %v235_v22 }
  0x9a   : > { %v273_v35 = vmul.f32 %v511_v21, %v264_v25 }
  0x9b   : > { %v276_v40 = vadd.f32 %v272_v34, %v248_v32 }
  0x9c   : > { %v290_v28 = vpop.permute.xlu0 %289  ;;  %v277_v43 = vadd.f32 %v273_v35, %v249_v39 }
  0x9d   : > { %v303_v29 = vadd.f32 %v290_v28, %v275_v27 }
  0x9e   : > { %v285_v31 = vpop.permute.xlu1 %284 }
  0x9f   : > { %v302_v33 = vadd.f32 %v285_v31, %v274_v30  ;;  %v307_v36 = vmax.f32 %v303_v29, 0.0 }
  0xa0   : > { %v317_v52 = vpop.permute.xlu0 %316 }
  0xa1   : > { %v306_v37 = vmax.f32 %v302_v33, 0.0 }
  0xa2   : > { %v295_v38 = vpop.permute.xlu1 %294 }
  0xa3   : > { %v535_v41 = vpack.c.bf16 %v307_v36, %v306_v37  ;;  %v304_v42 = vadd.f32 %v295_v38, %v276_v40 }
  0xa5   : > { %536 = vmatprep.subr.bf16.mxu0 %v535_v41  ;;  %v308_v46 = vmax.f32 %v304_v42, 0.0 }
  0xa6   : > { %v300_v44 = vpop.permute.xlu1 %299  ;;  %538 = vmatpush3.bf16.msra.mxu0 %v535_v41 }
  0xa7   : > { %v305_v45 = vadd.f32 %v300_v44, %v277_v43 }
  0xa9   : > { %v309_v47 = vmax.f32 %v305_v45, 0.0 }
  0xaa   : > { %v322_v50 = vpop.permute.xlu1 %321 }
  0xab   : > { %v539_v48 = vpack.c.bf16 %v309_v47, %v308_v46 }
  0xad   : > { %540 = vmatprep.subr.bf16.mxu0 %v539_v48 }
  0xae   : > { %542 = vmatpush3.bf16.msra.mxu0 %v539_v48 }
  0xb1   : > { %533 = vmatmul.mubr.msk.f32.vlgmr.msra.gmra.mrb[0].mxu0 %vm324_vm0, %v311_v49 }
 0x182   : > { %414 = sbr.rel (!%p656_p4) target bundleno = 401 (0x191), region = 44 }
 0x184   : > { %v534_v51 = vpop.f32.mrb[0].mxu0 }
 0x185   : > { %v403_v53 = vadd.f32 %v534_v51, %v322_v50  ;;  %v397_v54 = vpop.f32.mrb[1].mxu0 }
 0x186   : > { %v398_v55 = vadd.f32 %v397_v54, %v317_v52 }
 0x187   : > { %407 = vst [vmem:[%s211_s14 + $0x8] sm:$0xff] %v403_v53 }
 0x188   : > { %406 = vst [vmem:[%s211_s14] sm:$0xff] %v398_v55 }
 0x18e   : > { %v448_v57 = vld [vmem:[%s211_s14 + $0x8] sm:$0xff] }
 0x18f   : > { %v446_v56 = vld [vmem:[%s211_s14] sm:$0xff]  ;;  %449 = vst [vmem:[%s416_s18 + $0x10] sm:$0xff] %v448_v57 }
 0x190   : > { %447 = vst [vmem:[%s416_s18] sm:$0xff] %v446_v56 }
 0x191 PF: > { %p12_p8 = scmp.ge.s32.totalorder %s646_s22, 4   ;;  %s727_s18 = smov %s593_s19 }
 0x192   : > { %s728_s19 = smov %s654_s25  ;;  %s729_s20 = smov %s646_s22 }
 0x193   :  { %14 = sbr.rel (!%p12_p8) target bundleno = 2 (0x2), region = 108 }

</bundles_post_ra>
